<compile_context>
chip_gen: v7x
topology: tpu7x:2x2x1
jax: 0.10.0
libtpu: 0.0.40
codegen_flags: <defaults>
</compile_context>

<pallas_src>
import jax
import jax.numpy as jnp
from jax.experimental import pallas as pl
from jax.experimental.pallas import tpu as pltpu


def _normalize_kernel(x_ref, o_ref):
    # o = x / 255.0, computed in f32 (correct for integer/uint8 frames and
    # bit-exact vs. the reference division), then cast to the output dtype.
    x = x_ref[...].astype(jnp.float32)
    o_ref[...] = (x / 255.0).astype(o_ref.dtype)


def functional_module(x, *, out_dtype=None, block_rows=512, lane_width=1024):
    """Pallas implementation of FunctionalModule(lambda n: n / 255.0)."""
    # Output dtype: preserve float inputs, promote integer frames to f32.
    if out_dtype is None:
        out_dtype = x.dtype if jnp.issubdtype(x.dtype, jnp.floating) else jnp.float32
    out_dtype = jnp.dtype(out_dtype)

    orig_shape = x.shape
    total = x.size

    # --- Flatten to a lane-dense (M, K) slab, K a multiple of 128 ------------
    K = lane_width
    flat = x.reshape(-1)
    pad = (-total) % K
    if pad:
        flat = jnp.pad(flat, (0, pad))
    M = flat.size // K

    # Row tile: large blocks (-> few, cheap grid steps), padded so M % TM == 0.
    TM = min(block_rows, M)
    rpad = (-M) % TM
    if rpad:
        flat = jnp.pad(flat, (0, rpad * K))
        M += rpad
    x2 = flat.reshape(M, K)

    # Elementwise + shape/dtype-preserving => output may alias the input HBM
    # buffer (saves a second full-size allocation).
    io_alias = {0: 0} if x2.dtype == out_dtype else {}

    out2 = pl.pallas_call(
        _normalize_kernel,
        out_shape=jax.ShapeDtypeStruct((M, K), out_dtype),
        grid=(M // TM,),
        in_specs=[pl.BlockSpec((TM, K), lambda i: (i, 0))],
        out_specs=pl.BlockSpec((TM, K), lambda i: (i, 0)),
        input_output_aliases=io_alias,
        compiler_params=pltpu.CompilerParams(
            # Parallel row-tile axis: megacore sharding on v7x, no-op otherwise.
            dimension_semantics=("parallel",),
        ),
    )(x2)

    return out2.reshape(-1)[:total].reshape(orig_shape)


if __name__ == "__main__":
    key = jax.random.PRNGKey(0)

    # Small NCHW video-frame-like input (batch=2, channels=4, 16x16 spatial).
    x_f32 = jax.random.uniform(key, (2, 4, 16, 16), dtype=jnp.float32) * 255.0
    ref_f32 = x_f32 / 255.0  # reference computed up front (before any aliasing)

    out_f32 = jax.block_until_ready(functional_module(x_f32))
    assert out_f32.shape == x_f32.shape and out_f32.dtype == x_f32.dtype
    assert jnp.allclose(out_f32, ref_f32, atol=1e-6, rtol=1e-6)

    # uint8 video frames (the actual AVSR use case): normalized float32 output.
    x_u8 = jax.random.randint(key, (2, 4, 16, 16), 0, 256).astype(jnp.uint8)
    ref_u8 = x_u8.astype(jnp.float32) / 255.0

    out_u8 = jax.block_until_ready(functional_module(x_u8))
    assert out_u8.shape == x_u8.shape and out_u8.dtype == jnp.float32
    assert jnp.allclose(out_u8, ref_u8, atol=1e-6, rtol=1e-6)

    print("KERNEL_OK")
</pallas_src>

<mosaic_0001>
module attributes {stable_mosaic.version = 11 : i64} {
  func.func @_normalize_kernel(%arg0: i32, %arg1: memref<2x1024xf32, #tpu.memory_space<vmem>>, %arg2: memref<2x1024xf32, #tpu.memory_space<vmem>>) attributes {dimension_semantics = [#tpu.dimension_semantics<parallel>], iteration_bounds = array<i64: 1>, scalar_prefetch = 0 : i64, scratch_operands = 0 : i64, tpu.core_type = #tpu.core_type<tc>, window_params = [{transform_indices = @transform_0, window_bounds = array<i64: 2, 1024>}, {transform_indices = @transform_1, window_bounds = array<i64: 2, 1024>}]} {
    %c0 = arith.constant 0 : index
    %c0_0 = arith.constant 0 : index
    %0 = vector.load %arg1[%c0, %c0_0] : memref<2x1024xf32, #tpu.memory_space<vmem>>, vector<2x1024xf32>
    %cst = arith.constant 2.550000e+02 : f32
    %1 = vector.broadcast %cst : f32 to vector<2x1024xf32>
    %2 = arith.divf %0, %1 : vector<2x1024xf32>
    %c0_1 = arith.constant 0 : index
    %c0_2 = arith.constant 0 : index
    %3 = vector.load %arg2[%c0_1, %c0_2] : memref<2x1024xf32, #tpu.memory_space<vmem>>, vector<2x1024xf32>
    tpu.vector_store %arg2[%c0_1, %c0_2], %2 {strides = array<i32>} : memref<2x1024xf32, #tpu.memory_space<vmem>>, vector<2x1024xf32>,
    return
  }
  func.func @transform_0(%arg0: i32) -> (i32, i32) {
    %c0_i32 = arith.constant 0 : i32
    %c0_i32_0 = arith.constant 0 : i32
    return %arg0, %c0_i32 : i32, i32
  }
  func.func @transform_1(%arg0: i32) -> (i32, i32) {
    %c0_i32 = arith.constant 0 : i32
    %c0_i32_0 = arith.constant 0 : i32
    return %arg0, %c0_i32 : i32, i32
  }
}

</mosaic_0001>

<bundles_post_ra>
// kernel: tpu_custom_call.1
= control target key start
LH: loop header
LB: loop body
LE: loop exit
PB: predicated region body
PF: predicated region fallthrough
CT: control target
= control target key end

     0   :  { %6 = vsyncpa [#allocation3], 0  ;;  %s129_s0 = inlined_call_operand.hbm [shape: f32[2,1024], index: 0, kind: input, shape index: {}, may-alias: {0,1}]   ;;  %s130_s1 = inlined_call_operand.hbm [shape: f32[2,1024], index: 1, kind: output, shape index: {}, may-alias: {0,1}]  }
   0x1   :  { %7 = vsyncpa [#allocation4], 0  ;;  %s93_s6 = smov [#allocation2]   ;;  %s45_s10 = scalar_lea.hbm %s129_s0, 256 }
   0x2   :  { %s14_s7 = sshll.u32 %s93_s6, 4  ;;  %p46_p0 = scmp.ne.s32.totalorder %s129_s0, %s45_s10  ;;  %s15_s7 = int_to_ptr.vmem [resolvable:$true] %s14_s7 }
   0x3   :  { %p49_p1 = scmp.lt.u32.totalorder %s45_s10, %s129_s0 }
   0x5   :  { %p51_p2 = pnand %p49_p1, %p46_p0 }
   0x7   :  { %54 = shalt.err (!%p51_p2)
}
   0x8   :  { %s55_s15 = scalar_lea.vmem %s15_s7, 256  ;;  %p60_p4 = scmp.lt.s32.totalorder %s15_s7, %s15_s7 }
   0x9   :  { %p56_p3 = scmp.ne.s32.totalorder %s15_s7, %s55_s15  ;;  %p61_p5 = scmp.lt.s32.totalorder %s55_s15, %s55_s15 }
   0xb   :  { %p62_p6 = por %p61_p5, %p60_p4 }
   0xd   :  { %p63_p7 = pnand %p62_p6, %p56_p3 }
   0xf   :  { %66 = shalt.err (!%p63_p7)
}
  0x10   :  { %17 = dma.hbm_to_vmem [thread:$0]  %s129_s0, 256, %s15_s7, [#allocation3]  }
  0x11   :  { %89 = dma.done.wait [#allocation3], 256  }
  0x12   :  { %90 = vsyncadd [#allocation3], 4294967040  ;;  %s94_s18 = smov [#allocation5]   ;;  %v21_v0 = vld [vmem:[#allocation2] sm:$0xff]  ;;  %v22_v1 = vld [vmem:[#allocation2 + $0x8] sm:$0xff] }
  0x13   :  { %s34_s19 = sshll.u32 %s94_s18, 4  ;;  %v24_v2 = vmul.f32 0.003921569, %v21_v0  ;;  %v25_v3 = vmul.f32 0.003921569, %v22_v1  ;;  %s35_s19 = int_to_ptr.vmem [resolvable:$true] %s34_s19 }
  0x14   :  { %s67_s20 = scalar_lea.vmem %s35_s19, 256  ;;  %p72_p9 = scmp.lt.s32.totalorder %s35_s19, %s35_s19 }
  0x15   :  { %26 = vst [vmem:[#allocation5] sm:$0xff] %v24_v2  ;;  %27 = vst [vmem:[#allocation5 + $0x8] sm:$0xff] %v25_v3  ;;  %p68_p8 = scmp.ne.s32.totalorder %s35_s19, %s67_s20  ;;  %p73_p10 = scmp.lt.s32.totalorder %s67_s20, %s67_s20 }
  0x17   :  { %p74_p11 = por %p73_p10, %p72_p9 }
  0x19   :  { %p75_p12 = pnand %p74_p11, %p68_p8 }
  0x1b   :  { %78 = shalt.err (!%p75_p12)
}
  0x1c   :  { %s79_s22 = scalar_lea.hbm %s130_s1, 256 }
  0x1d   :  { %p80_p13 = scmp.ne.s32.totalorder %s130_s1, %s79_s22  ;;  %p83_p0 = scmp.lt.u32.totalorder %s79_s22, %s130_s1 }
  0x1f   :  { %p85_p1 = pnand %p83_p0, %p80_p13 }
  0x21   :  { %88 = shalt.err (!%p85_p1)
}
  0x22   :  { %37 = dma.vmem_to_hbm [thread:$0]  %s35_s19, 256, %s130_s1, [#allocation4]  }
  0x23   :  { %91 = dma.done.wait [#allocation4], 256  }
  0x24   :  { %92 = vsyncadd [#allocation4], 4294967040 }
  0x25   :  { %41 = vsyncpa [#allocation3], 1 }
  0x26   :  { %42 = vsyncpa [#allocation4], 1 }

</bundles_post_ra>
